<compile_context>
chip_gen: v5e
topology: v5e:2x2
jax: 0.10.0
libtpu: 0.0.40
codegen_flags: <defaults>
</compile_context>

<pallas_src>
import jax
import jax.numpy as jnp
from jax.experimental import pallas as pl
from jax.experimental.pallas import tpu as pltpu

_VMEM_LIMIT_BYTES = 32 * 1024 * 1024        # legal on v5e/v6e/v7x
_VMEM_TILE_BUDGET = 20 * 1024 * 1024        # headroom under the limit


def _linear_noacc_kernel(x_ref, w_ref, b_ref, o_ref):
    # x_ref : (tb, C_in, tn)   channels on sublanes / spatial on lanes
    # w_ref : (tco, C_in)      weight tile (resident: constant index map)
    # b_ref : (tco, 1)         bias tile
    # o_ref : (tb, tco, tn)    lane-dense output slab
    w = w_ref[...]
    b = b_ref[...]
    for i in range(x_ref.shape[0]):          # tb is small & static -> unrolled
        y = jnp.dot(w, x_ref[i], preferred_element_type=jnp.float32)
        o_ref[i] = (y + b).astype(o_ref.dtype)


def _linear_acc_kernel(x_ref, w_ref, b_ref, o_ref, acc_ref):
    # Grid: (batch, spatial_tile, cout_tile, cin_tile) -- reduction innermost.
    # acc_ref: (tco, tn) f32 VMEM accumulator, resident across the k axis.
    k = pl.program_id(3)

    @pl.when(k == 0)
    def _():
        acc_ref[...] = jnp.zeros_like(acc_ref)

    acc_ref[...] += jnp.dot(
        w_ref[...], x_ref[0], preferred_element_type=jnp.float32
    )

    @pl.when(k == pl.num_programs(3) - 1)
    def _():
        o_ref[0] = (acc_ref[...] + b_ref[...]).astype(o_ref.dtype)


def linear_1x1_conv(x, weight, bias, *,
                    vmem_budget_bytes=_VMEM_TILE_BUDGET,
                    max_spatial_tile=4096):
    """1x1 Conv2d with bias.

    x:      (B, C_in, H, W)   NCHW, like PyTorch
    weight: (C_out, C_in, 1, 1)
    bias:   (C_out,)
    returns (B, C_out, H, W)
    """
    B, C_in, H, W = x.shape
    C_out = weight.shape[0]
    HW = H * W

    # ---- free reshapes only (no HBM transposes) ----
    x3 = x.reshape(B, C_in, HW)            # (B, C_in, HW)
    w2 = weight.reshape(C_out, C_in)       # (C_out, C_in)
    b2 = bias.reshape(C_out, 1)            # (C_out, 1)

    xb = jnp.dtype(x3.dtype).itemsize
    wb = jnp.dtype(w2.dtype).itemsize
    bb = jnp.dtype(b2.dtype).itemsize
    ob = xb                                # output dtype == input dtype

    flops = 2 * B * C_out * C_in * HW
    base_bytes = (x3.size * xb + w2.size * wb + b2.size * bb
                  + B * C_out * HW * ob)
    cost = pl.CostEstimate(flops=flops, transcendentals=0,
                           bytes_accessed=base_bytes)
    compiler_limit = _VMEM_LIMIT_BYTES

    # ================= Path A: resident weight, no reduction tiling =========
    def bytes_a(tb, tn):
        return (2 * tb * C_in * tn * xb       # x (double-buffered)
                + 2 * tb * C_out * tn * ob    # out (double-buffered)
                + 2 * C_out * C_in * wb       # weight (counted 2x, conservative)
                + 2 * C_out * bb)             # bias

    tn_min = min(HW, 128)
    if bytes_a(1, tn_min) <= vmem_budget_bytes:
        # Largest lane tile that fits the budget (full extent if HW is small).
        if HW <= max_spatial_tile and bytes_a(1, HW) <= vmem_budget_bytes:
            tn = HW                                      # full-dim block
        else:
            tn = max(128, (min(max_spatial_tile, HW) // 128) * 128)
            while tn > 128 and bytes_a(1, tn) > vmem_budget_bytes:
                tn -= 128
        nj = pl.cdiv(HW, tn)

        # Small spatial extent: block several batch images per grid step.
        tb = 1
        if nj == 1:
            while tb < B and bytes_a(tb * 2, tn) <= vmem_budget_bytes:
                tb *= 2
            tb = min(tb, B)
        nb = pl.cdiv(B, tb)

        out3 = pl.pallas_call(
            _linear_noacc_kernel,
            out_shape=jax.ShapeDtypeStruct((B, C_out, HW), x.dtype),
            grid_spec=pltpu.PrefetchScalarGridSpec(
                num_scalar_prefetch=0,
                grid=(nb, nj),
                in_specs=[
                    pl.BlockSpec((tb, C_in, tn), lambda b, j: (b, 0, j)),
                    # Constant index maps -> weight/bias DMA'd exactly once.
                    pl.BlockSpec((C_out, C_in), lambda b, j: (0, 0)),
                    pl.BlockSpec((C_out, 1), lambda b, j: (0, 0)),
                ],
                out_specs=pl.BlockSpec((tb, C_out, tn), lambda b, j: (b, 0, j)),
            ),
            compiler_params=pltpu.CompilerParams(
                dimension_semantics=("parallel", "parallel"),
                vmem_limit_bytes=compiler_limit,
            ),
            cost_estimate=cost,
        )(x3, w2, b2)
        return out3.reshape(B, C_out, H, W)

    # ================= Path B: channel-tiled (large C_in / C_out) ===========
    tn = min(HW, 512)
    if tn < HW:
        tn = max(128, (tn // 128) * 128)

    # Reduction tile tk: full C_in if it fits, else a 128-multiple with the
    # contraction dim zero-padded (zeros contribute nothing to the sum).
    if 2 * C_in * tn * xb <= vmem_budget_bytes // 3:
        tk = C_in
    else:
        tk = 128
        for cand in (2048, 1024, 512, 256, 128):
            if 2 * cand * tn * xb <= vmem_budget_bytes // 3:
                tk = cand
                break
        c_in_pad = pl.cdiv(C_in, tk) * tk
        if c_in_pad != C_in:
            x3 = jnp.pad(x3, ((0, 0), (0, c_in_pad - C_in), (0, 0)))
            w2 = jnp.pad(w2, ((0, 0), (0, c_in_pad - C_in)))
    C_in_eff = x3.shape[1]

    def bytes_b(tco, tk_, tn_):
        return (2 * tk_ * tn_ * xb + 2 * tco * tn_ * ob
                + 2 * tco * tk_ * wb + 2 * tco * bb + tco * tn_ * 4)

    # Grow tco toward C_out first: x HBM traffic scales as C_out / tco.
    tco = None
    for cand in [C_out] + [c for c in (1024, 512, 256, 128, 64, 32, 16, 8)
                           if c < C_out]:
        if bytes_b(cand, tk, tn) <= vmem_budget_bytes:
            tco = cand
            break
    if tco is None:
        tco = min(C_out, 8)

    nk = C_in_eff // tk
    nco = pl.cdiv(C_out, tco)
    nj = pl.cdiv(HW, tn)

    if nk == 1:
        # Single reduction step: skip the accumulator entirely.
        out3 = pl.pallas_call(
            _linear_noacc_kernel,
            out_shape=jax.ShapeDtypeStruct((B, C_out, HW), x.dtype),
            grid_spec=pltpu.PrefetchScalarGridSpec(
                num_scalar_prefetch=0,
                grid=(B, nj, nco),
                in_specs=[
                    pl.BlockSpec((1, C_in_eff, tn), lambda b, j, co: (b, 0, j)),
                    pl.BlockSpec((tco, C_in_eff), lambda b, j, co: (co, 0)),
                    pl.BlockSpec((tco, 1), lambda b, j, co: (co, 0)),
                ],
                out_specs=pl.BlockSpec((1, tco, tn),
                                       lambda b, j, co: (b, co, j)),
            ),
            compiler_params=pltpu.CompilerParams(
                dimension_semantics=("parallel", "parallel", "parallel"),
                vmem_limit_bytes=compiler_limit,
            ),
            cost_estimate=cost,
        )(x3, w2, b2)
    else:
        out3 = pl.pallas_call(
            _linear_acc_kernel,
            out_shape=jax.ShapeDtypeStruct((B, C_out, HW), x.dtype),
            grid_spec=pltpu.PrefetchScalarGridSpec(
                num_scalar_prefetch=0,
                grid=(B, nj, nco, nk),
                in_specs=[
                    pl.BlockSpec((1, tk, tn), lambda b, j, co, k: (b, k, j)),
                    pl.BlockSpec((tco, tk), lambda b, j, co, k: (co, k)),
                    pl.BlockSpec((tco, 1), lambda b, j, co, k: (co, 0)),
                ],
                out_specs=pl.BlockSpec((1, tco, tn),
                                       lambda b, j, co, k: (b, co, j)),
                scratch_shapes=[pltpu.VMEM((tco, tn), jnp.float32)],
            ),
            compiler_params=pltpu.CompilerParams(
                dimension_semantics=("parallel", "parallel", "parallel",
                                     "arbitrary"),
                vmem_limit_bytes=compiler_limit,
            ),
            cost_estimate=cost,
        )(x3, w2, b2)

    return out3.reshape(B, C_out, H, W)


if __name__ == "__main__":
    # Small shapes consistent with the module's forward: NCHW input.
    B, C_in, C_out, H, W = 2, 4, 8, 16, 16

    key = jax.random.PRNGKey(0)
    kx, kw, kb = jax.random.split(key, 3)

    x = jax.random.normal(kx, (B, C_in, H, W), dtype=jnp.float32)

    # Deterministic parameter init (kaiming-uniform-style bounds like PyTorch Conv2d).
    fan_in = C_in * 1 * 1
    bound = 1.0 / jnp.sqrt(jnp.float32(fan_in))
    weight = jax.random.uniform(kw, (C_out, C_in, 1, 1), jnp.float32, -bound, bound)
    bias = jax.random.uniform(kb, (C_out,), jnp.float32, -bound, bound)

    y = linear_1x1_conv(x, weight, bias)
    y = jax.block_until_ready(y)

    # Reference check in plain JAX (same math as Conv2d with 1x1 kernel).
    y_ref = jnp.einsum("bchw,oc->bohw", x, weight.reshape(C_out, C_in)) \
            + bias.reshape(1, C_out, 1, 1)
    assert y.shape == (B, C_out, H, W)
    assert jnp.allclose(y, y_ref, atol=1e-5, rtol=1e-5)

    print("KERNEL_OK")
</pallas_src>

<mosaic_0001>
module attributes {stable_mosaic.version = 11 : i64} {
  func.func @_linear_noacc_kernel(%arg0: i32, %arg1: i32, %arg2: memref<2x4x256xf32, #tpu.memory_space<vmem>>, %arg3: memref<8x4xf32, #tpu.memory_space<vmem>>, %arg4: memref<8x1xf32, #tpu.memory_space<vmem>>, %arg5: memref<2x8x256xf32, #tpu.memory_space<vmem>>) attributes {dimension_semantics = [#tpu.dimension_semantics<parallel>, #tpu.dimension_semantics<parallel>], iteration_bounds = array<i64: 1, 1>, scalar_prefetch = 0 : i64, scratch_operands = 0 : i64, tpu.core_type = #tpu.core_type<tc>, window_params = [{transform_indices = @transform_0, window_bounds = array<i64: 2, 4, 256>}, {pipeline_mode = #tpu.pipeline_mode<synchronous>, transform_indices = @transform_1, window_bounds = array<i64: 8, 4>}, {pipeline_mode = #tpu.pipeline_mode<synchronous>, transform_indices = @transform_2, window_bounds = array<i64: 8, 1>}, {transform_indices = @transform_3, window_bounds = array<i64: 2, 8, 256>}]} {
    %c0 = arith.constant 0 : index
    %c0_0 = arith.constant 0 : index
    %0 = vector.load %arg3[%c0, %c0_0] : memref<8x4xf32, #tpu.memory_space<vmem>>, vector<8x4xf32>
    %c0_1 = arith.constant 0 : index
    %c0_2 = arith.constant 0 : index
    %1 = vector.load %arg4[%c0_1, %c0_2] : memref<8x1xf32, #tpu.memory_space<vmem>>, vector<8x1xf32>
    %c0_3 = arith.constant 0 : index
    %c0_4 = arith.constant 0 : index
    %c0_5 = arith.constant 0 : index
    %2 = vector.load %arg2[%c0_3, %c0_4, %c0_5] : memref<2x4x256xf32, #tpu.memory_space<vmem>>, vector<1x4x256xf32>
    %3 = vector.shape_cast %2 : vector<1x4x256xf32> to vector<4x256xf32>
    %cst = arith.constant dense<0.000000e+00> : vector<8x256xf32>
    %4 = tpu.matmul %0, %3, %cst {dimension_numbers = #tpu.dot_dimension_numbers<[1], [0], [0], [1], [0, 0, 1, 1], [], []>} : vector<8x4xf32>, vector<4x256xf32>, vector<8x256xf32> -> vector<8x256xf32>
    %5 = vector.broadcast %1 : vector<8x1xf32> to vector<8x256xf32>
    %6 = arith.addf %4, %5 : vector<8x256xf32>
    %c0_6 = arith.constant 0 : index
    %c0_7 = arith.constant 0 : index
    %c0_8 = arith.constant 0 : index
    %7 = vector.load %arg5[%c0_6, %c0_7, %c0_8] : memref<2x8x256xf32, #tpu.memory_space<vmem>>, vector<1x8x256xf32>
    %8 = vector.shape_cast %7 : vector<1x8x256xf32> to vector<8x256xf32>
    %9 = vector.shape_cast %6 : vector<8x256xf32> to vector<1x8x256xf32>
    tpu.vector_store %arg5[%c0_6, %c0_7, %c0_8], %9 {strides = array<i32>} : memref<2x8x256xf32, #tpu.memory_space<vmem>>, vector<1x8x256xf32>,
    %c1 = arith.constant 1 : index
    %c0_9 = arith.constant 0 : index
    %c0_10 = arith.constant 0 : index
    %10 = vector.load %arg2[%c1, %c0_9, %c0_10] : memref<2x4x256xf32, #tpu.memory_space<vmem>>, vector<1x4x256xf32>
    %11 = vector.shape_cast %10 : vector<1x4x256xf32> to vector<4x256xf32>
    %cst_11 = arith.constant dense<0.000000e+00> : vector<8x256xf32>
    %12 = tpu.matmul %0, %11, %cst_11 {dimension_numbers = #tpu.dot_dimension_numbers<[1], [0], [0], [1], [0, 0, 1, 1], [], []>} : vector<8x4xf32>, vector<4x256xf32>, vector<8x256xf32> -> vector<8x256xf32>
    %13 = vector.broadcast %1 : vector<8x1xf32> to vector<8x256xf32>
    %14 = arith.addf %12, %13 : vector<8x256xf32>
    %c1_12 = arith.constant 1 : index
    %c0_13 = arith.constant 0 : index
    %c0_14 = arith.constant 0 : index
    %15 = vector.load %arg5[%c1_12, %c0_13, %c0_14] : memref<2x8x256xf32, #tpu.memory_space<vmem>>, vector<1x8x256xf32>
    %16 = vector.shape_cast %15 : vector<1x8x256xf32> to vector<8x256xf32>
    %17 = vector.shape_cast %14 : vector<8x256xf32> to vector<1x8x256xf32>
    tpu.vector_store %arg5[%c1_12, %c0_13, %c0_14], %17 {strides = array<i32>} : memref<2x8x256xf32, #tpu.memory_space<vmem>>, vector<1x8x256xf32>,
    return
  }
  func.func @transform_0(%arg0: i32, %arg1: i32) -> (i32, i32, i32) {
    %c0_i32 = arith.constant 0 : i32
    %c0_i32_0 = arith.constant 0 : i32
    return %arg0, %c0_i32, %arg1 : i32, i32, i32
  }
  func.func @transform_1(%arg0: i32, %arg1: i32) -> (i32, i32) {
    %c0_i32 = arith.constant 0 : i32
    %c0_i32_0 = arith.constant 0 : i32
    %c0_i32_1 = arith.constant 0 : i32
    return %c0_i32, %c0_i32_0 : i32, i32
  }
  func.func @transform_2(%arg0: i32, %arg1: i32) -> (i32, i32) {
    %c0_i32 = arith.constant 0 : i32
    %c0_i32_0 = arith.constant 0 : i32
    %c0_i32_1 = arith.constant 0 : i32
    return %c0_i32, %c0_i32_0 : i32, i32
  }
  func.func @transform_3(%arg0: i32, %arg1: i32) -> (i32, i32, i32) {
    %c0_i32 = arith.constant 0 : i32
    %c0_i32_0 = arith.constant 0 : i32
    return %arg0, %c0_i32, %arg1 : i32, i32, i32
  }
}

</mosaic_0001>

<bundles_post_ra>
// kernel: tpu_custom_call.1
= control target key start
LH: loop header
LB: loop body
LE: loop exit
PB: predicated region body
PF: predicated region fallthrough
CT: control target
= control target key end

     0   :  { %v189_v1 = vmov 0   ;;  %s228_s0 = inlined_call_operand.vmem [shape: f32[2,4,256], index: 0, kind: input, shape index: {}]   ;;  %s229_s1 = inlined_call_operand.vmem [shape: f32[8,4], index: 1, kind: input, shape index: {}]   ;;  %s230_s2 = inlined_call_operand.vmem [shape: f32[8,1], index: 2, kind: input, shape index: {}]   ;;  %s231_s3 = inlined_call_operand.hbm [shape: f32[2,8,256], index: 3, kind: output, shape index: {}]  }
   0x1   :  { %v17_v0 = vld [vmem:[%s228_s0] sm:$0xff]  ;;  %162 = vset.pattern.permute.xlu0 %v189_v1 }
   0x2   :  { %24 = vst [vmem:[#allocation1] ss:$2 sm:$0xff] %v17_v0  ;;  %v16_v2 = vld [vmem:[%s230_s2] sm:$0xff] }
   0x3   :  { %8 = vsyncpa [#allocation3], 0  ;;  %20 = vperm.xlu0 %162, %v16_v2   ;;  %v153_v3 = vld [vmem:[%s228_s0 + $0x8] sm:$0xff]  ;;  %vm31_vm0 = vcmask 1043456   ;;  %v15_v6 = vld [vmem:[%s229_s1] sm:$0xff]  ;;  %vm27_vm1 = vcmask 31744  }
   0x4   :  { %s190_s0 = smov [#allocation2]   ;;  %s137_s21 = sshll.u32 %s231_s3, 4  ;;  %s138_s21 = int_to_ptr.hbm [resolvable:$true] %s137_s21 }
   0x5   :  { %s135_s1 = sshll.u32 %s190_s0, 4  ;;  %s191_s22 = smov 256   ;;  %s136_s1 = int_to_ptr.vmem [resolvable:$true] %s135_s1 }
   0x6   :  { %s192_s23 = smov 16  }
   0x9   :  { %v25_v4 = vld.sshfl [vmem:[#allocation1] sm:$0xff pattern:$0x75316420]  ;;  %v26_v5 = vld.sshfl [vmem:[#allocation1 + $0x8] sm:$0xff pattern:$0x75316420] }
   0xa   :  { %81 = vst [vmem:[#allocation1] ss:$2 sm:$0xff] %v153_v3  ;;  %149 = vmatpush.msk.msra.mxu0 %vm31_vm0, %v25_v4  ;;  %151 = vmatpush.msk.msra.mxu1 %vm31_vm0, %v26_v5 }
   0xb   :  { %150 = vmatmul.msk.f32.vlgmr.msra.gmra.mxu0 %vm27_vm1, %v15_v6  ;;  %152 = vmatmul.msk.f32.vlgmr.msra.gmra.mxu1 %vm27_vm1, %v15_v6 }
  0x11   :  { %v82_v7 = vld.sshfl [vmem:[#allocation1] sm:$0xff pattern:$0x75316420]  ;;  %v83_v8 = vld.sshfl [vmem:[#allocation1 + $0x8] sm:$0xff pattern:$0x75316420] }
  0x12   :  { %154 = vmatpush.msk.msra.mxu2 %vm31_vm0, %v82_v7  ;;  %156 = vmatpush.msk.msra.mxu3 %vm31_vm0, %v83_v8 }
  0x13   :  { %155 = vmatmul.msk.f32.vlgmr.msra.gmra.mxu2 %vm27_vm1, %v15_v6  ;;  %157 = vmatmul.msk.f32.vlgmr.msra.gmra.mxu3 %vm27_vm1, %v15_v6 }
  0x75   :  { %v21_v9 = vpop.permute.xlu0 %20 }
  0x88   :  { %v53_v10 = vpop.f32.mrf.mxu0  ;;  %v73_v11 = vpop.f32.mrf.mxu1 }
  0x89   :  { %v54_v12 = vadd.f32 %v53_v10, %v21_v9  ;;  %v74_v13 = vadd.f32 %v73_v11, %v21_v9 }
  0x8b   :  { %76 = vst [vmem:[#allocation2] sm:$0xff] %v54_v12 }
  0x8c   :  { %77 = vst [vmem:[#allocation2 + $0x8] sm:$0xff] %v74_v13 }
  0x96   :  { %v105_v14 = vpop.f32.mrf.mxu2  ;;  %v125_v15 = vpop.f32.mrf.mxu3 }
  0x97   :  { %v106_v16 = vadd.f32 %v105_v14, %v21_v9  ;;  %v126_v17 = vadd.f32 %v125_v15, %v21_v9 }
  0x99   :  { %129 = vst [vmem:[#allocation2 + $0x10] sm:$0xff] %v106_v16 }
  0x9a   :  { %130 = vst [vmem:[#allocation2 + $0x18] sm:$0xff] %v126_v17 }
  0x9b   :  { %143 = dma.vmem_to_hbm [thread:$0]  %s136_s1, 512, %s138_s21, [#allocation3], %s191_s22, %s191_s22, %s192_s23  }
  0x9c   :  { %187 = dma.done.wait [#allocation3], 512  }
  0x9d   :  { %188 = vsyncadd [#allocation3], 4294966784 }
  0x9e   :  { %148 = vsyncpa [#allocation3], 1 }

</bundles_post_ra>
